<compile_context>
chip_gen: v5e
topology: v5e:2x2
jax: 0.10.0
libtpu: 0.0.40
codegen_flags: <defaults>
</compile_context>

<pallas_src>
import functools

import jax
import jax.numpy as jnp
import numpy as np
from jax.experimental import pallas as pl
from jax.experimental.pallas import tpu as pltpu

SIZE = 3                      # conv kernel size (matches MeanConv(size=3))
CLAMP_MIN = 1e-10


# ---------------------------------------------------------------------------
# Kernel
# ---------------------------------------------------------------------------
def _mean_conv_kernel(*refs, k, W, TP, Hp, have_halo, ragged):
    """Separable 3x3 mean filter on one (NB, TP, k*W) block.

    Packed layout: image row r lives at packed row r // k, lanes
    [(r % k) * W, (r % k + 1) * W).  k == 1 is the plain (rows, W) layout.
    Refs: x, [halo (NB,1,2,W)], wb (2,) in SMEM, out.
    """
    if have_halo:
        x_ref, halo_ref, wb_ref, o_ref = refs
    else:
        x_ref, wb_ref, o_ref = refs

    LW = k * W
    x = x_ref[...].astype(jnp.float32)                       # (NB, TP, LW)

    # ---- horizontal 3-tap sum with reflection at image-column borders --------
    if k == 1:
        # Reflection encoded directly in the concat: col -1 -> col 1, col W -> col W-2.
        t_l = jnp.concatenate([x[..., 1:2], x[..., :-1]], axis=-1)
        t_r = jnp.concatenate([x[..., 1:], x[..., W - 2:W - 1]], axis=-1)
        s = x + t_l + t_r
    else:
        left = jnp.concatenate([x[..., :1], x[..., :-1]], axis=-1)    # x[l-1]
        right = jnp.concatenate([x[..., 1:], x[..., -1:]], axis=-1)   # x[l+1]
        col = jax.lax.broadcasted_iota(jnp.int32, (1, 1, LW), 2) % W
        t_l = jnp.where(col == 0, right, left)        # reflect col -1 -> col 1
        t_r = jnp.where(col == W - 1, left, right)    # reflect col W  -> col W-2
        s = x + t_l + t_r

    # ---- horizontal sums of the rows just above / below this tile ------------
    def _row_sum(row):                                        # row: (NB, 1, W)
        l = jnp.concatenate([row[..., 1:2], row[..., :-1]], axis=-1)
        r = jnp.concatenate([row[..., 1:], row[..., W - 2:W - 1]], axis=-1)
        return row + l + r

    if have_halo:
        hl = halo_ref[...].astype(jnp.float32)                # (NB, 1, 2, W)
        r_top = _row_sum(hl[:, :, 0, :])                      # (NB, 1, W)
        r_bot = _row_sum(hl[:, :, 1, :])
    else:
        # Single tile covers the whole image: the reflection rows (image rows 1
        # and H-2) are already inside `s`.
        if k == 1:
            r_top = s[:, 1:2, :]
            r_bot = s[:, Hp - 2:Hp - 1, :]
        else:
            r_top = s[:, 0:1, W:2 * W]
            r_bot = s[:, Hp - 1:Hp, (k - 2) * W:(k - 1) * W]

    # ---- vertical 3-tap sum of s ----------------------------------------------
    # head[p] / tail[p]: what segment 0 / segment k-1 of packed row p needs from
    # its row-above / row-below (previous/next packed row or the halo row).
    if TP > 1:
        head = jnp.concatenate([r_top, s[:, :TP - 1, LW - W:]], axis=1)   # (NB,TP,W)
        tail = jnp.concatenate([s[:, 1:, :W], r_bot], axis=1)             # (NB,TP,W)
    else:
        head, tail = r_top, r_bot

    if k == 1:
        up, dn = head, tail                                   # s[row-1], s[row+1]
    else:
        up = jnp.concatenate([head, s[..., :LW - W]], axis=-1)
        dn = jnp.concatenate([s[..., W:], tail], axis=-1)

    if ragged:
        # Ragged last tile: the true last image row (packed row Hp-1, segment k-1)
        # may sit in the tile interior; its "below" neighbour is the reflected row
        # H-2, which is exactly `up` at that position.
        prow = (jax.lax.broadcasted_iota(jnp.int32, (1, TP, 1), 1)
                + pl.program_id(1) * TP)
        last_row = prow == Hp - 1
        if k == 1:
            dn = jnp.where(last_row, up, dn)
        else:
            lane = jax.lax.broadcasted_iota(jnp.int32, (1, 1, LW), 2)
            dn = jnp.where(jnp.logical_and(last_row, lane // W == k - 1), up, dn)

    acc = s + up
    acc = acc + dn

    w = wb_ref[0]
    b = wb_ref[1]
    out = jnp.maximum(acc * w + b, CLAMP_MIN)
    o_ref[...] = out.astype(o_ref.dtype)


# ---------------------------------------------------------------------------
# Wrapper / tiling heuristics
# ---------------------------------------------------------------------------
def _pick_pack_factor(H, W):
    """Image rows packed per lane-row (free, contiguous reshape).  1 = no packing."""
    if W >= 128 or H < 2:
        return 1
    limit = min(H, max(1, 1024 // W))
    for k in range(2, limit + 1):
        if H % k == 0 and (k * W) % 128 == 0:     # smallest k giving lane-dense rows
            return k
    return 1


def _pick_tile_rows(Hp, row_bytes, block_bytes, sub):
    """Packed rows per tile: a multiple of `sub` (or all of Hp) within the budget."""
    max_rows = max(1, block_bytes // row_bytes)
    if max_rows >= Hp:
        return Hp
    tp = (max_rows // sub) * sub
    if tp < sub:
        tp = sub
    return Hp if tp >= Hp else tp


def _pick_batch_block(N, n_h, per_image_bytes, block_bytes, target_steps=8):
    """Images per block: amortize per-step overhead on tiny images while keeping
    >= target_steps grid steps (both v7x TensorCores stay busy)."""
    want = min(target_steps, N * n_h)
    nb = 1
    for d in range(1, N + 1):
        if N % d:
            continue
        if d * per_image_bytes > max(block_bytes, per_image_bytes):
            continue
        if (N // d) * n_h < want:
            continue
        nb = d
    return nb


def _default_block_bytes():
    # ~2 MiB slabs are safe everywhere (v7x: 64 MiB VMEM, 32 MiB scoped default);
    # bump to 4 MiB on 128-MiB-VMEM parts (v5e/v6e) to amortize per-step overhead.
    try:
        if pltpu.get_tpu_info().vmem_capacity_bytes >= (96 << 20):
            return 4 << 20
    except Exception:
        pass
    return 2 << 20


def mean_conv_reference(x, weight, bias):
    """Plain-JAX reference: reflect-pad 3x3 conv + bias + clamp (matches MeanConv)."""
    N, C, H, W = x.shape
    xpad = jnp.pad(x[:, 0].astype(jnp.float32), ((0, 0), (1, 1), (1, 1)), mode="reflect")
    w2d = weight.astype(jnp.float32).reshape(SIZE, SIZE)
    ref = jnp.zeros((N, H, W), jnp.float32)
    for dh in range(SIZE):
        for dw in range(SIZE):
            ref = ref + xpad[:, dh:dh + H, dw:dw + W] * w2d[dh, dw]
    ref = ref + bias.astype(jnp.float32).reshape(-1)[0]
    return jnp.maximum(ref, CLAMP_MIN)[:, None, :, :].astype(x.dtype)


def mean_conv(x, weight, bias, *, block_bytes=None):
    """MeanConv forward.  x: (N, 1, H, W); weight: (1, 1, 3, 3) uniform; bias: (1,)."""
    N, C, H, W = x.shape
    assert C == 1, "MeanConv is a 1->1 channel conv"
    assert H >= 2 and W >= 2, "reflect padding(1) needs H >= 2 and W >= 2"

    # The Pallas kernel is specialized to MeanConv's uniform weights (all 1/size^2).
    # Fall back to the plain-JAX path if that invariant is detectably violated.
    try:
        w_host = np.asarray(jax.device_get(weight)).reshape(-1)
        if not np.allclose(w_host, w_host[0]):
            # TODO(synk): generic (non-uniform) 3x3 weights stay on the XLA path.
            return mean_conv_reference(x, weight, bias)
    except Exception:
        pass  # traced weights: trust the MeanConv invariant

    if block_bytes is None:
        block_bytes = _default_block_bytes()

    x3 = x[:, 0]                                           # (N, H, W)
    itemsize = x3.dtype.itemsize
    sub = max(8, 32 // max(1, itemsize))                   # min sublane multiple for dtype

    k = _pick_pack_factor(H, W)                            # rows packed per lane-row
    Hp, LW = H // k, k * W
    xp = x3.reshape(N, Hp, LW)                             # free: rows are contiguous

    TP = _pick_tile_rows(Hp, LW * itemsize, block_bytes, sub)   # packed rows per tile
    n_h = pl.cdiv(Hp, TP)
    have_halo = n_h > 1
    ragged = (Hp % TP) != 0
    NB = _pick_batch_block(N, n_h, TP * LW * itemsize, block_bytes)
    TH = TP * k                                            # original image rows per tile

    wb = jnp.stack([weight.astype(jnp.float32).reshape(-1)[0],
                    bias.astype(jnp.float32).reshape(-1)[0]])      # (2,) -> SMEM

    kernel = functools.partial(_mean_conv_kernel, k=k, W=W, TP=TP, Hp=Hp,
                               have_halo=have_halo, ragged=ragged)

    in_specs = [pl.BlockSpec((NB, TP, LW), lambda bb, hh: (bb, hh, 0))]
    args = [xp]
    if have_halo:
        # One original-image row just above / below each H tile, already reflected
        # at the true image borders (first tile: row 1; last tile: row H-2).
        top_rows = np.array([1 if t == 0 else t * TH - 1 for t in range(n_h)], np.int32)
        bot_rows = np.array([(t + 1) * TH if (t + 1) * TH <= H - 1 else H - 2
                             for t in range(n_h)], np.int32)
        halo = jnp.stack([x3[:, top_rows, :], x3[:, bot_rows, :]], axis=2)  # (N,n_h,2,W)
        in_specs.append(pl.BlockSpec((NB, 1, 2, W), lambda bb, hh: (bb, hh, 0, 0)))
        args.append(halo)
    in_specs.append(pl.BlockSpec(memory_space=pltpu.MemorySpace.SMEM))
    args.append(wb)

    out = pl.pallas_call(
        kernel,
        out_shape=jax.ShapeDtypeStruct((N, Hp, LW), x.dtype),
        grid=(N // NB, n_h),
        in_specs=in_specs,
        out_specs=pl.BlockSpec((NB, TP, LW), lambda bb, hh: (bb, hh, 0)),
        compiler_params=pltpu.CompilerParams(
            dimension_semantics=("parallel", "parallel"),
            vmem_limit_bytes=32 * 1024 * 1024,
        ),
    )(*args)

    return out.reshape(N, H, W)[:, None]                   # (N, 1, H, W)


# ---------------------------------------------------------------------------
# Self-test
# ---------------------------------------------------------------------------
if __name__ == "__main__":
    key = jax.random.PRNGKey(0)
    k0, k1, k2 = jax.random.split(key, 3)

    # MeanConv parameters exactly as in __init__: all weights 1/size^2, bias 0.
    weight = jnp.full((1, 1, SIZE, SIZE), 1.0 / SIZE ** 2, dtype=jnp.float32)
    bias = jnp.zeros((1,), dtype=jnp.float32)

    # 1) Small single-channel image: W=16 < 128 takes the lane-packed path
    #    (k=8 -> 128-lane rows), single H tile, grid=(2, 1).
    xa = jax.random.normal(k0, (2, 1, 16, 16), dtype=jnp.float32)
    ya = mean_conv(xa, weight, bias)
    jax.block_until_ready(ya)
    assert ya.shape == xa.shape
    assert jnp.allclose(ya, mean_conv_reference(xa, weight, bias), atol=1e-5, rtol=1e-5), \
        "mismatch vs reference (packed, single-tile path)"

    # 2) Force the multi-tile halo + ragged-tail path, unpacked (W=128, TH=8, 6 tiles).
    xb = jax.random.normal(k1, (2, 1, 44, 128), dtype=jnp.float32)
    yb = mean_conv(xb, weight, bias, block_bytes=8 * 128 * 4)
    jax.block_until_ready(yb)
    assert jnp.allclose(yb, mean_conv_reference(xb, weight, bias), atol=1e-5, rtol=1e-5), \
        "mismatch vs reference (unpacked, halo + ragged path)"

    # 3) Force the multi-tile halo + ragged-tail path in packed layout (W=16, k=8).
    xc = jax.random.normal(k2, (2, 1, 136, 16), dtype=jnp.float32)
    yc = mean_conv(xc, weight, bias, block_bytes=8 * 128 * 4)
    jax.block_until_ready(yc)
    assert jnp.allclose(yc, mean_conv_reference(xc, weight, bias), atol=1e-5, rtol=1e-5), \
        "mismatch vs reference (packed, halo + ragged path)"

    print("KERNEL_OK")
</pallas_src>

<mosaic_0001>
module attributes {stable_mosaic.version = 11 : i64} {
  func.func @_mean_conv_kernel(%arg0: i32, %arg1: i32, %arg2: memref<1x2x128xf32, #tpu.memory_space<vmem>>, %arg3: memref<2xf32, #tpu.memory_space<smem>>, %arg4: memref<1x2x128xf32, #tpu.memory_space<vmem>>) attributes {dimension_semantics = [#tpu.dimension_semantics<parallel>, #tpu.dimension_semantics<parallel>], iteration_bounds = array<i64: 2, 1>, scalar_prefetch = 0 : i64, scratch_operands = 0 : i64, tpu.core_type = #tpu.core_type<tc>, window_params = [{transform_indices = @transform_0, window_bounds = array<i64: 1, 2, 128>}, {transform_indices = @transform_1, window_bounds = array<i64: 2>}, {transform_indices = @transform_2, window_bounds = array<i64: 1, 2, 128>}]} {
    %c0 = arith.constant 0 : index
    %c0_0 = arith.constant 0 : index
    %c0_1 = arith.constant 0 : index
    %0 = vector.load %arg2[%c0, %c0_0, %c0_1] : memref<1x2x128xf32, #tpu.memory_space<vmem>>, vector<1x2x128xf32>
    %1 = vector.extract_strided_slice %0 {offsets = [0, 0, 0], sizes = [1, 2, 1], strides = [1, 1, 1]} : vector<1x2x128xf32> to vector<1x2x1xf32>
    %2 = vector.extract_strided_slice %0 {offsets = [0, 0, 0], sizes = [1, 2, 127], strides = [1, 1, 1]} : vector<1x2x128xf32> to vector<1x2x127xf32>
    %3 = tpu.concatenate %1, %2 in 2 : vector<1x2x1xf32>, vector<1x2x127xf32> -> vector<1x2x128xf32>
    %4 = vector.extract_strided_slice %0 {offsets = [0, 0, 1], sizes = [1, 2, 127], strides = [1, 1, 1]} : vector<1x2x128xf32> to vector<1x2x127xf32>
    %5 = vector.extract_strided_slice %0 {offsets = [0, 0, 127], sizes = [1, 2, 1], strides = [1, 1, 1]} : vector<1x2x128xf32> to vector<1x2x1xf32>
    %6 = tpu.concatenate %4, %5 in 2 : vector<1x2x127xf32>, vector<1x2x1xf32> -> vector<1x2x128xf32>
    %7 = tpu.iota {dimensions = array<i32: 2>} : vector<1x1x128xi32>
    %c16_i32 = arith.constant 16 : i32
    %c0_i32 = arith.constant 0 : i32
    %8 = arith.cmpi eq, %c16_i32, %c0_i32 : i32
    %c1_i32 = arith.constant 1 : i32
    %9 = arith.select %8, %c1_i32, %c16_i32 : i32
    %10 = vector.broadcast %9 : i32 to vector<1x1x128xi32>
    %11 = arith.remsi %7, %10 : vector<1x1x128xi32>
    %c0_i32_2 = arith.constant 0 : i32
    %12 = vector.broadcast %c0_i32_2 : i32 to vector<1x1x128xi32>
    %13 = arith.cmpi ne, %11, %12 : vector<1x1x128xi32>
    %c0_i32_3 = arith.constant 0 : i32
    %14 = vector.broadcast %c0_i32_3 : i32 to vector<1x1x128xi32>
    %15 = arith.cmpi slt, %11, %14 : vector<1x1x128xi32>
    %c0_i32_4 = arith.constant 0 : i32
    %16 = arith.cmpi slt, %9, %c0_i32_4 : i32
    %17 = vector.broadcast %16 : i1 to vector<1x1x128xi1>
    %18 = vector.broadcast %17 : vector<1x1x128xi1> to vector<1x1x128xi1>
    %19 = arith.xori %15, %18 : vector<1x1x128xi1>
    %20 = arith.andi %19, %13 : vector<1x1x128xi1>
    %21 = vector.broadcast %9 : i32 to vector<1x1x128xi32>
    %22 = arith.addi %11, %21 : vector<1x1x128xi32>
    %23 = arith.select %20, %22, %11 : vector<1x1x128xi1>, vector<1x1x128xi32>
    %c0_i32_5 = arith.constant 0 : i32
    %24 = vector.broadcast %c0_i32_5 : i32 to vector<1x1x128xi32>
    %25 = arith.cmpi eq, %23, %24 : vector<1x1x128xi32>
    %26 = vector.shape_cast %25 : vector<1x1x128xi1> to vector<1x1x128xi1>
    %27 = vector.broadcast %26 : vector<1x1x128xi1> to vector<1x2x128xi1>
    %28 = arith.select %27, %6, %3 : vector<1x2x128xi1>, vector<1x2x128xf32>
    %c15_i32 = arith.constant 15 : i32
    %29 = vector.broadcast %c15_i32 : i32 to vector<1x1x128xi32>
    %30 = arith.cmpi eq, %23, %29 : vector<1x1x128xi32>
    %31 = vector.shape_cast %30 : vector<1x1x128xi1> to vector<1x1x128xi1>
    %32 = vector.broadcast %31 : vector<1x1x128xi1> to vector<1x2x128xi1>
    %33 = arith.select %32, %3, %6 : vector<1x2x128xi1>, vector<1x2x128xf32>
    %34 = arith.addf %0, %28 : vector<1x2x128xf32>
    %35 = arith.addf %34, %33 : vector<1x2x128xf32>
    %36 = vector.extract_strided_slice %35 {offsets = [0, 0, 16], sizes = [1, 1, 16], strides = [1, 1, 1]} : vector<1x2x128xf32> to vector<1x1x16xf32>
    %37 = vector.extract_strided_slice %35 {offsets = [0, 1, 96], sizes = [1, 1, 16], strides = [1, 1, 1]} : vector<1x2x128xf32> to vector<1x1x16xf32>
    %38 = vector.extract_strided_slice %35 {offsets = [0, 0, 112], sizes = [1, 1, 16], strides = [1, 1, 1]} : vector<1x2x128xf32> to vector<1x1x16xf32>
    %39 = tpu.concatenate %36, %38 in 1 : vector<1x1x16xf32>, vector<1x1x16xf32> -> vector<1x2x16xf32>
    %40 = vector.extract_strided_slice %35 {offsets = [0, 1, 0], sizes = [1, 1, 16], strides = [1, 1, 1]} : vector<1x2x128xf32> to vector<1x1x16xf32>
    %41 = tpu.concatenate %40, %37 in 1 : vector<1x1x16xf32>, vector<1x1x16xf32> -> vector<1x2x16xf32>
    %42 = vector.extract_strided_slice %35 {offsets = [0, 0, 0], sizes = [1, 2, 112], strides = [1, 1, 1]} : vector<1x2x128xf32> to vector<1x2x112xf32>
    %43 = tpu.concatenate %39, %42 in 2 : vector<1x2x16xf32>, vector<1x2x112xf32> -> vector<1x2x128xf32>
    %44 = vector.extract_strided_slice %35 {offsets = [0, 0, 16], sizes = [1, 2, 112], strides = [1, 1, 1]} : vector<1x2x128xf32> to vector<1x2x112xf32>
    %45 = tpu.concatenate %44, %41 in 2 : vector<1x2x112xf32>, vector<1x2x16xf32> -> vector<1x2x128xf32>
    %46 = arith.addf %35, %43 : vector<1x2x128xf32>
    %47 = arith.addf %46, %45 : vector<1x2x128xf32>
    %c0_6 = arith.constant 0 : index
    %48 = memref.load %arg3[%c0_6] : memref<2xf32, #tpu.memory_space<smem>>
    %c1 = arith.constant 1 : index
    %49 = memref.load %arg3[%c1] : memref<2xf32, #tpu.memory_space<smem>>
    %50 = vector.broadcast %48 : f32 to vector<1x2x128xf32>
    %51 = arith.mulf %47, %50 : vector<1x2x128xf32>
    %52 = vector.broadcast %49 : f32 to vector<1x2x128xf32>
    %53 = arith.addf %51, %52 : vector<1x2x128xf32>
    %cst = arith.constant 1.000000e-10 : f32
    %54 = vector.broadcast %cst : f32 to vector<1x2x128xf32>
    %55 = arith.maximumf %53, %54 : vector<1x2x128xf32>
    %c0_7 = arith.constant 0 : index
    %c0_8 = arith.constant 0 : index
    %c0_9 = arith.constant 0 : index
    %56 = vector.load %arg4[%c0_7, %c0_8, %c0_9] : memref<1x2x128xf32, #tpu.memory_space<vmem>>, vector<1x2x128xf32>
    tpu.vector_store %arg4[%c0_7, %c0_8, %c0_9], %55 {strides = array<i32>} : memref<1x2x128xf32, #tpu.memory_space<vmem>>, vector<1x2x128xf32>,
    return
  }
  func.func @transform_0(%arg0: i32, %arg1: i32) -> (i32, i32, i32) {
    %c0_i32 = arith.constant 0 : i32
    %c0_i32_0 = arith.constant 0 : i32
    return %arg0, %arg1, %c0_i32 : i32, i32, i32
  }
  func.func @transform_1(%arg0: i32, %arg1: i32) -> i32 {
    %c0_i32 = arith.constant 0 : i32
    %c0_i32_0 = arith.constant 0 : i32
    return %c0_i32 : i32
  }
  func.func @transform_2(%arg0: i32, %arg1: i32) -> (i32, i32, i32) {
    %c0_i32 = arith.constant 0 : i32
    %c0_i32_0 = arith.constant 0 : i32
    return %arg0, %arg1, %c0_i32 : i32, i32, i32
  }
}

</mosaic_0001>

<bundles_post_ra>
// kernel: tpu_custom_call.1
= control target key start
LH: loop header
LB: loop body
LE: loop exit
PB: predicated region body
PF: predicated region fallthrough
CT: control target
= control target key end

     0   :  { %7 = vsyncpa [#allocation3], 0  ;;  %s775_s0 = inlined_call_operand.hbm [shape: f32[2,2,128], index: 0, kind: input, shape index: {}]   ;;  %s776_s1 = inlined_call_operand.hbm [shape: f32[2], index: 1, kind: input, shape index: {}]   ;;  %s777_s2 = inlined_call_operand.hbm [shape: f32[2,2,128], index: 2, kind: output, shape index: {}]  }
   0x1   :  { %9 = vsyncpa [#allocation3 + $0x1], 0 }
   0x2   :  { %10 = vsyncpa [#allocation5], 0 }
   0x3   :  { %11 = vsyncpa [#allocation4], 0 }
   0x4   :  { %13 = vsyncpa [#allocation4 + $0x1], 0  ;;  %s626_s9 = smov 0   ;;  %s628_s10 = smov 0  }
   0x5   :  { %s630_s11 = smov 0   ;;  %s632_s12 = smov 0  }
   0x6   :  { %s634_s13 = smov 0   ;;  %s636_s14 = smov 0  }
   0x7 LB: > { %s378_s15 = sadd.s32 4294967295, %s603_s14   ;;  %s379_s16 = sadd.s32 4294967294, %s603_s14   ;;  %s603_s14 = sphi %s636_s14, %s19_s14   ;;  %s599_s13 = sphi %s634_s13, %s789_s13   ;;  %s595_s12 = sphi %s632_s12, %s788_s12   ;;  %s591_s11 = sphi %s630_s11, %s787_s11   ;;  %s587_s10 = sphi %s628_s10, %s786_s10   ;;  %s583_s9 = sphi %s626_s9, %s785_s9  }
   0x8   : > { %p53_p0 = scmp.ne.s32.totalorder %s587_s10, %s583_s9  ;;  %p660_p1 = scmp.eq.s32.totalorder %s378_s15, 0 }
   0x9   : > { %p664_p2 = scmp.eq.s32.totalorder %s378_s15, 1  ;;  %p106_p3 = scmp.eq.s32.totalorder %s379_s16, 1 }
   0xa   : > { %p670_p4 = por %p660_p1, %p53_p0  ;;  %p380_p5 = scmp.ge.s32.totalorder %s603_s14, 1 }
   0xb   : > { %p675_p6 = por %p106_p3, %p53_p0  ;;  %p113_p7 = scmp.lt.s32.totalorder %s603_s14, 3 }
   0xc   : > { %s125_s23 = sshll.u32 %s776_s1, 4  ;;  %s31_s25 = sadd.s32 1, %s599_s13  ;;  %s126_s23 = int_to_ptr.hbm [resolvable:$true] %s125_s23 }
   0xd   : > { %p683_p8 = pnand %p380_p5, %p113_p7  ;;  %s40_s26 = sadd.s32 1, %s591_s11 }
   0xe   : > { %p33_p12 = scmp.ge.s32.totalorder %s31_s25, 2  ;;  %s605_s27 = smov [#allocation6]  }
   0xf   : > { %p402_p10 = pneg %p683_p8  ;;  %p47_p13 = scmp.ne.s32.totalorder %s591_s11, %s587_s10 }
  0x10   : > { %s791_s25 = smov (%p33_p12, %s31_s25), 0  ;;  %p48_p0 = scmp.eq.s32.totalorder %s603_s14, 0 }
  0x11   : > { %p403_p11 = pnand %p402_p10, %p660_p1  ;;  %s35_s28 = ssub.s32 %s599_s13, %s791_s25 }
  0x12   : > { %p415_p3 = scmp.lt.s32.totalorder %s603_s14, 2  ;;  %p38_p5 = scmp.eq.s32.totalorder %s35_s28, 0 }
  0x13   : > { %405 = dma.hbm_to_smem (!%p403_p11), %s126_s23, 16, %s605_s27, [#allocation5]  }
  0x14   : > { %p49_p7 = por %p48_p0, %p47_p13  ;;  %p704_p9 = por %p664_p2, %p47_p13 }
  0x15   : > { %s136_s30 = sand.u32 1, %s591_s11   ;;  %s384_s5 = sshll.u32 %s599_s13, 1 }
  0x16   : > { %s710_s3 = scalar_select %p38_p5, %s591_s11, %s40_s26  }
  0x17   : > { %s383_s4 = sshll.u32 %s136_s30, 1  ;;  %s145_s8 = scalar_lea.hbm %s775_s0, %s384_s5 }
  0x18   : > { %s140_s15 = scalar_lea.vmem [#allocation2], %s383_s4  ;;  %s147_s21 = sshll.u32 %s145_s8, 4  ;;  %s148_s21 = int_to_ptr.hbm [resolvable:$true] %s147_s21 }
  0x19   : > { %s149_s16 = sshll.u32 %s140_s15, 4  ;;  %p407_p10 = pnand %p415_p3, %p49_p7  ;;  %s150_s16 = int_to_ptr.vmem [resolvable:$true] %s149_s16 }
  0x1a   : > { %s137_s18 = scalar_lea.sflag [#allocation3], %s136_s30  ;;  %158 = sbr.rel (%p683_p8) target bundleno = 419 (0x1a3), region = 28 }
  0x1b   : > { %409 = dma.hbm_to_vmem [thread:$0]  (!%p407_p10), %s148_s21, 32, %s150_s16, %s137_s18  }
  0x1c   : > { %s721_s22 = sand.u32 (!%p683_p8), 1, %s587_s10  }
  0x1d   : > { %s386_s23 = sshll.u32 (!%p683_p8), %s721_s22, 1  ;;  %s161_s26 = scalar_lea.sflag (!%p683_p8), [#allocation3], %s721_s22 }
  0x1e   : > { %s164_s27 = scalar_lea.vmem (!%p683_p8), [#allocation2], %s386_s23 }
  0x1f   : > { %570 = dma.done.wait (%p670_p4), %s161_s26, 32  }
  0x20   : > { %572 = vsyncadd (%p670_p4), %s161_s26, 4294967264 }
  0x21   : > { %574 = dma.done.wait (%p660_p1), [#allocation5], 16  }
  0x22   : > { %576 = vsyncadd (%p660_p1), [#allocation5], 4294967280 }
  0x23   : > { %175 = sfence }
  0x24   : > { %v192_v0 = vld [vmem:[%s164_s27] sm:$0x3]  ;;  %s606_s24 = smov 1   ;;  %s607_s28 = smov 127   ;;  %v204_v1 = vlaneseq  ;;  %vm197_vm0 = vcmask 7168   ;;  %vm202_vm1 = vcmask 1039360  }
  0x25   : > { %194 = vrot.lane.b32.xlu0 %v192_v0, %s606_s24  ;;  %s608_s17 = smov 112   ;;  %s609_s19 = smov 32   ;;  %vm233_vm4 = vcmask 1040384   ;;  %vm248_vm5 = vcmask 130048   ;;  %vm257_vm6 = vcmask 916480  }
  0x26   : > { %v205_v2 = vand.u32 127, %v204_v1  ;;  %s610_s30 = smov 16   ;;  %s261_s4 = sld [smem:[#allocation6]] }
  0x27   : > { %s389_s5 = sld [smem:[#allocation6 + $0x1]]  ;;  %s391_s6 = sshll.u32 %s595_s12, 1 }
  0x28   : > { %v210_v4 = vand.u32 15, %v205_v2  ;;  %s281_s15 = scalar_lea.hbm %s777_s2, %s391_s6  ;;  %s191_s16 = scalar_lea.vmem [#allocation7], %s386_s23 }
  0x29   : > { %s283_s21 = sshll.u32 %s191_s16, 4  ;;  %s285_s18 = sshll.u32 %s281_s15, 4  ;;  %s284_s21 = int_to_ptr.vmem [resolvable:$true] %s283_s21  ;;  %s286_s18 = int_to_ptr.hbm [resolvable:$true] %s285_s18 }
  0x2a   : > { %vm218_vm2 = vcmp.eq.s32.totalorder %v210_v4, 0  ;;  %vm222_vm3 = vcmp.eq.s32.totalorder %v210_v4, 15  ;;  %s270_s12 = scalar_lea.sflag [#allocation4], %s721_s22  ;;  %s531_s26 = sshra.s32 %s286_s18, 4  ;;  %s532_s26 = int_to_ptr.hbm [resolvable:$true] %s531_s26 }
  0x2b   : > { %s533_s27 = scalar_lea.hbm %s532_s26, 2  ;;  %p538_p8 = scmp.lt.s32.totalorder %s532_s26, %s777_s2 }
  0x2c   : > { %v263_v24 = vstv %s261_s4  ;;  %p534_p1 = scmp.ne.s32.totalorder %s532_s26, %s533_s27 }
  0x2d   : > { %199 = vrot.lane.b32.xlu0 %v192_v0, %s607_s28  ;;  %v265_v27 = vstv %s389_s5 }
  0x2e   : > { %p535_p2 = pnand %p534_p1, %p704_p9 }
  0x30   : > { %p536_p4 = pneg %p535_p2 }
  0x97   : > { %v195_v3 = vpop.permute.xlu0 %194 }
  0x98   : > { %v198_v6 = vsel %vm197_vm0, %v192_v0, %v195_v3 }
  0x9f   : > { %v200_v5 = vpop.permute.xlu0 %199 }
  0xa0   : > { %v203_v7 = vsel %vm202_vm1, %v200_v5, %v192_v0 }
  0xa1   : > { %v221_v8 = vsel %vm218_vm2, %v203_v7, %v198_v6  ;;  %v225_v10 = vsel %vm222_vm3, %v198_v6, %v203_v7 }
  0xa2   : > { %v226_v9 = vadd.f32 %v221_v8, %v192_v0 }
  0xa4   : > { %v227_v11 = vadd.f32 %v226_v9, %v225_v10 }
  0xa6   : > { %250 = vrot.lane.b32.xlu0 %v227_v11, %s608_s17  ;;  %v229_v12 = vrot.slane %v227_v11, 7  ;;  %v235_v15 = vrot.slane %v227_v11, 1 }
  0xa8   : > { %230 = vrot.lane.b32.xlu1 %v229_v12, %s609_s19 }
  0xb0   : > { %237 = vrot.lane.b32.xlu1 %v227_v11, %s609_s19 }
 0x118   : > { %v251_v21 = vpop.permute.xlu0 %250 }
 0x11a   : > { %v231_v13 = vpop.permute.xlu1 %230 }
 0x11b   : > { %v234_v14 = vsel %vm233_vm4, %v227_v11, %v231_v13 }
 0x11c   : > { %242 = vrot.lane.b32.xlu2 %v234_v14, %s608_s17 }
 0x122   : > { %v238_v16 = vpop.permute.xlu1 %237 }
 0x123   : > { %v240_v17 = vsel %vm233_vm4, %v235_v15, %v238_v16 }
 0x124   : > { %245 = vrot.lane.b32.xlu2 %v227_v11, %s610_s30  ;;  %254 = vrot.lane.b32.xlu1 %v240_v17, %s608_s17  ;;  %s537_s17 = scalar_lea.hbm %s777_s2, 4 }
 0x125   : > { %p539_p11 = scmp.lt.s32.totalorder %s537_s17, %s533_s27 }
 0x127   : > { %p540_p12 = por %p539_p11, %p538_p8 }
 0x129   : > { %p541_p13 = pnand %p540_p12, %p536_p4 }
 0x176   : > { %v243_v18 = vpop.permute.xlu2 %242 }
 0x17e   : > { %v246_v19 = vpop.permute.xlu2 %245 }
 0x17f   : > { %v249_v20 = vsel %vm248_vm5, %v243_v18, %v246_v19 }
 0x180   : > { %v259_v22 = vadd.f32 %v249_v20, %v227_v11 }
 0x196   : > { %v255_v23 = vpop.permute.xlu1 %254 }
 0x197   : > { %v258_v25 = vsel %vm257_vm6, %v251_v21, %v255_v23 }
 0x198   : > { %v260_v26 = vadd.f32 %v259_v22, %v258_v25 }
 0x19a   : > { %v264_v28 = vmul.f32 %v263_v24, %v260_v26 }
 0x19c   : > { %v266_v29 = vadd.f32 %v265_v27, %v264_v28 }
 0x19e   : > { %v267_v30 = vmax.f32 %v266_v29, 1e-10 }
 0x1a0   : > { %268 = vst [vmem:[%s191_s16] sm:$0x3] %v267_v30 }
 0x1a1   : > { %544 = shalt.err (!%p541_p13)
}
 0x1a2   : > { %400 = dma.vmem_to_hbm [thread:$0]  (%p704_p9), %s284_s21, 32, %s286_s18, %s270_s12  }
 0x1a3 PF: > { %s297_s22 = sand.u32 1, %s583_s9   ;;  %p784_p0 = scmp.ge.s32.totalorder %s603_s14, 2 }
 0x1a4   : > { %s298_s30 = scalar_lea.sflag [#allocation4], %s297_s22 }
 0x1a5   : > { %p411_p3 = pnand %p784_p0, %p675_p6 }
 0x1a7   : > { %p412_p5 = pneg %p411_p3 }
 0x1a9   : > { %578 = dma.done.wait (%p412_p5), %s298_s30, 32  }
 0x1aa   : > { %580 = vsyncadd (%p412_p5), %s298_s30, 4294967264  ;;  %s19_s14 = sadd.s32 1, %s603_s14   ;;  %s785_s9 = smov %s587_s10 }
 0x1ab   : > { %p16_p7 = scmp.ge.s32.totalorder %s19_s14, 4   ;;  %s786_s10 = smov %s591_s11 }
 0x1ac   : > { %s787_s11 = smov %s710_s3  ;;  %s788_s12 = smov %s599_s13 }
 0x1ad   : > { %s789_s13 = smov %s791_s25  ;;  %18 = sbr.rel (!%p16_p7) target bundleno = 7 (0x7), region = 78 }
 0x1b2   :  { %304 = vsyncpa [#allocation3], 1 }
 0x1b3   :  { %306 = vsyncpa [#allocation3 + $0x1], 1 }
 0x1b4   :  { %307 = vsyncpa [#allocation4], 1 }
 0x1b5   :  { %309 = vsyncpa [#allocation4 + $0x1], 1 }
 0x1b6   :  { %310 = vsyncpa [#allocation5], 1 }
 0x1b7   :  { %312 = vsyncpa [#allocation5 + $0x1], 1 }

</bundles_post_ra>
